<compile_context>
chip_gen: v6e
topology: v6e:2x2x1
jax: 0.10.0
libtpu: 0.0.40
codegen_flags: <defaults>
</compile_context>

<pallas_src>
import functools

import jax
import jax.numpy as jnp
from jax.experimental import pallas as pl
from jax.experimental.pallas import tpu as pltpu


def _round_up(x, m):
    return (x + m - 1) // m * m


# Non-linearities supported by BasicMLP (defaults match torch.nn defaults).
_ACTIVATIONS = {
    "relu": lambda v: jnp.maximum(v, 0.0),
    "tanh": jnp.tanh,
    "sigmoid": jax.nn.sigmoid,
    "elu": jax.nn.elu,
    "selu": jax.nn.selu,
    "softplus": jax.nn.softplus,
    "softsign": jax.nn.soft_sign,
    "leaky_relu": lambda v: jax.nn.leaky_relu(v, 0.01),
    "none": lambda v: v,
}
_NO_EUP = ("relu", "leaky_relu", "none", "softsign")

# Leave headroom under v7x's 64 MiB physical VMEM (v5e/v6e have 128 MiB).
_RESIDENT_VMEM_BUDGET = 40 * 1024 * 1024


def _mlp_kernel_resident(x_ref, w_ref, b_ref, o_ref, *, layer_pads, act):
    """Whole layer stack applied to one batch tile; weights VMEM-resident.

    x_ref: (tm, P_in)            padded input batch tile (f32)
    w_ref: (L, Din_p, Dout_p)    all padded weights (compute dtype), resident
    b_ref: (L, 1, Dout_p)        all padded biases (f32), resident
    o_ref: (tm, P_out)           padded output batch tile (f32)
    """
    h = x_ref[...].astype(jnp.float32)
    # Static Python loop (L is small).  Per-layer padded sub-blocks are sliced
    # statically at (8,128)-aligned boundaries, so no wasted MXU cycles on the
    # global-max padding.
    for l, (din, dout) in enumerate(layer_pads):
        w_l = w_ref[l, :din, :dout]          # (din, dout) compute dtype
        b_l = b_ref[l, :, :dout]             # (1, dout) f32
        y = jnp.dot(h.astype(w_l.dtype), w_l,
                    preferred_element_type=jnp.float32)
        h = act(y + b_l)                     # f32 epilogue on the VPU
    o_ref[...] = h.astype(o_ref.dtype)


def _mlp_kernel_streamed(x_ref, w_ref, b_ref, o_ref, *, din_p, dout_p, act):
    """One grid step = one layer on one batch tile; weights streamed per layer.

    o_ref (block index constant across the layer axis) is the VMEM-resident
    f32 activation; HBM writeback happens only when the batch tile changes.
    """
    layer = pl.program_id(1)

    @pl.when(layer == 0)
    def _():
        o_ref[...] = x_ref[...].astype(o_ref.dtype)

    h = o_ref[:, :din_p]
    y = jnp.dot(h.astype(w_ref.dtype), w_ref[0],
                preferred_element_type=jnp.float32)
    # Zero-padded weight rows guarantee stale lanes beyond dout_p contribute 0
    # to the next layer, and the wrapper slices the real output columns.
    o_ref[:, :dout_p] = act(y + b_ref[0])


def init_basic_mlp_params(key, input_dim, output_dim, hidden_dims):
    """Deterministic parameter init mirroring BasicMLP.__init__ layer shapes.

    Weights stored as [in_features, out_features] (transpose of PyTorch) so the
    kernel computes x @ W + b directly.
    """
    dims = [input_dim] + list(hidden_dims) + [output_dim]
    params = []
    for i in range(len(dims) - 1):
        key, kw, kb = jax.random.split(key, 3)
        fan_in, fan_out = dims[i], dims[i + 1]
        scale = 1.0 / jnp.sqrt(jnp.float32(fan_in))
        w = jax.random.uniform(kw, (fan_in, fan_out), jnp.float32, -scale, scale)
        b = jax.random.uniform(kb, (fan_out,), jnp.float32, -scale, scale)
        params.append((w, b))
    return params


def prepare_basic_mlp_params(params, compute_dtype=jnp.bfloat16):
    """Pad + stack per-layer (W, b) into one lane-dense slab (done once,
    outside the traced forward).

    Returns:
      w_stack: (L, max_in_pad, max_out_pad) in compute_dtype (zero-padded)
      b_stack: (L, 1, max_out_pad) in f32 (zero-padded)
      layer_pads: static tuple of (round_up(fan_in,128), round_up(fan_out,128))
    Zero-padding is semantics-preserving: padded input lanes hit zero weight
    rows, so they never contaminate real output lanes.
    """
    dims = [params[0][0].shape[0]] + [w.shape[1] for w, _ in params]
    in_pads = [_round_up(d, 128) for d in dims[:-1]]
    out_pads = [_round_up(d, 128) for d in dims[1:]]
    for l in range(len(params) - 1):
        assert out_pads[l] == in_pads[l + 1]
    din_max, dout_max = max(in_pads), max(out_pads)
    num_layers = len(params)

    w_stack = jnp.zeros((num_layers, din_max, dout_max), compute_dtype)
    b_stack = jnp.zeros((num_layers, 1, dout_max), jnp.float32)
    for l, (w, b) in enumerate(params):
        k, n = w.shape
        w_stack = w_stack.at[l, :k, :n].set(w.astype(compute_dtype))
        b_stack = b_stack.at[l, 0, :n].set(b.astype(jnp.float32))
    return w_stack, b_stack, tuple(zip(in_pads, out_pads))


@functools.partial(
    jax.jit,
    static_argnames=("out_dim", "layer_pads", "activation", "force_streamed"))
def basic_mlp_forward(x, w_stack, b_stack, out_dim, layer_pads,
                      activation="relu", force_streamed=False):
    """Eval-mode BasicMLP forward: (Dropout=identity -> Linear -> act) per layer,
    fused into a single pallas_call."""
    m, k = x.shape
    num_layers, din_max, dout_max = w_stack.shape
    act = _ACTIVATIONS[activation]
    w_bytes = jnp.dtype(w_stack.dtype).itemsize

    p_in = layer_pads[0][0]
    p_out = layer_pads[-1][1]
    d_act = max(din_max, dout_max)

    # --- batch tiling: >=8 sublanes, tiles up to 256 rows, and at least two
    # tiles for medium/large batches so v7x's 2 TensorCores both get work. ---
    m_pad = _round_up(max(m, 1), 8)
    tm = min(m_pad, 256)
    if m_pad // tm < 2 and m_pad >= 16:
        tm = _round_up(pl.cdiv(m_pad, 2), 8)
    m_pad = _round_up(m_pad, tm)
    n_tiles = m_pad // tm

    # VMEM budget check (counting double-buffered allocations conservatively).
    resident_bytes = (2 * num_layers * din_max * dout_max * w_bytes   # weights
                      + 2 * tm * p_in * 4 + 2 * tm * p_out * 4        # x / out
                      + 2 * num_layers * dout_max * 4                 # bias
                      + 2 * tm * d_act * 4)                           # temps
    use_resident = (not force_streamed) and resident_bytes <= _RESIDENT_VMEM_BUDGET

    flops = 2 * m_pad * sum(di * do for di, do in layer_pads)
    transcendentals = (0 if activation in _NO_EUP
                       else m_pad * sum(do for _, do in layer_pads))

    if use_resident:
        if (m, k) == (m_pad, p_in):
            x_p = x.astype(jnp.float32)
        else:
            x_p = jnp.zeros((m_pad, p_in), jnp.float32).at[:m, :k].set(
                x.astype(jnp.float32))

        bytes_accessed = (x_p.size * 4 + w_stack.size * w_bytes
                          + b_stack.size * 4 + m_pad * p_out * 4)
        kernel = functools.partial(_mlp_kernel_resident,
                                   layer_pads=layer_pads, act=act)
        out_padded = pl.pallas_call(
            kernel,
            out_shape=jax.ShapeDtypeStruct((m_pad, p_out), jnp.float32),
            grid=(n_tiles,),
            in_specs=[
                # one batch tile per grid step
                pl.BlockSpec((tm, p_in), lambda i: (i, 0)),
                # whole weight/bias stacks VMEM-resident (constant block index
                # -> DMA'd once, never re-streamed per batch tile or per layer)
                pl.BlockSpec((num_layers, din_max, dout_max),
                             lambda i: (0, 0, 0)),
                pl.BlockSpec((num_layers, 1, dout_max), lambda i: (0, 0, 0)),
            ],
            out_specs=pl.BlockSpec((tm, p_out), lambda i: (i, 0)),
            compiler_params=pltpu.CompilerParams(
                dimension_semantics=("parallel",),
                vmem_limit_bytes=min(max(2 * resident_bytes, 16 << 20),
                                     64 << 20)),
            cost_estimate=pl.CostEstimate(flops=flops,
                                          transcendentals=transcendentals,
                                          bytes_accessed=bytes_accessed),
        )(x_p, w_stack, b_stack)
        return out_padded[:m, :out_dim]

    # ---- streamed fallback: weight stack too large to keep resident ----
    if (m, k) == (m_pad, d_act):
        x_p = x.astype(jnp.float32)
    else:
        x_p = jnp.zeros((m_pad, d_act), jnp.float32).at[:m, :k].set(
            x.astype(jnp.float32))

    bytes_accessed = (x_p.size * 4 + n_tiles * w_stack.size * w_bytes
                      + n_tiles * b_stack.size * 4 + m_pad * d_act * 4)
    step_bytes = (2 * din_max * dout_max * w_bytes
                  + 4 * tm * d_act * 4 + 2 * dout_max * 4)
    kernel = functools.partial(_mlp_kernel_streamed,
                               din_p=din_max, dout_p=dout_max, act=act)
    out_padded = pl.pallas_call(
        kernel,
        out_shape=jax.ShapeDtypeStruct((m_pad, d_act), jnp.float32),
        grid=(n_tiles, num_layers),
        in_specs=[
            pl.BlockSpec((tm, d_act), lambda i, l: (i, 0)),
            pl.BlockSpec((1, din_max, dout_max), lambda i, l: (l, 0, 0)),
            pl.BlockSpec((1, 1, dout_max), lambda i, l: (l, 0, 0)),
        ],
        # constant block index along the layer axis -> o_ref is the resident
        # activation; written back to HBM only when the batch tile changes.
        out_specs=pl.BlockSpec((tm, d_act), lambda i, l: (i, 0)),
        compiler_params=pltpu.CompilerParams(
            dimension_semantics=("parallel", "arbitrary"),
            vmem_limit_bytes=min(max(2 * step_bytes, 16 << 20), 64 << 20)),
        cost_estimate=pl.CostEstimate(flops=flops,
                                      transcendentals=transcendentals,
                                      bytes_accessed=bytes_accessed),
    )(x_p, w_stack, b_stack)
    return out_padded[:m, :out_dim]


if __name__ == "__main__":
    key = jax.random.PRNGKey(0)
    batch, input_dim, output_dim = 2, 16, 8
    hidden_dims = [32]

    k_in, k_params, k_in2 = jax.random.split(key, 3)
    x = jax.random.normal(k_in, (batch, input_dim), jnp.float32)
    params = init_basic_mlp_params(k_params, input_dim, output_dim, hidden_dims)

    def reference(xv):
        h = xv
        for w, b in params:
            h = jnp.maximum(h @ w + b, 0.0)
        return h

    ref = reference(x)

    # f32 weights: exact match with the reference (resident path).
    w32, b32, pads = prepare_basic_mlp_params(params, jnp.float32)
    out = basic_mlp_forward(x, w32, b32, out_dim=output_dim, layer_pads=pads)
    jax.block_until_ready(out)
    assert out.shape == (batch, output_dim)
    assert jnp.allclose(out, ref, atol=1e-5, rtol=1e-5)

    # bf16 weights (default MXU fast path), f32 accumulation + epilogue.
    wbf, bbf, pads_bf = prepare_basic_mlp_params(params)  # bf16 default
    out_bf = basic_mlp_forward(x, wbf, bbf, out_dim=output_dim,
                               layer_pads=pads_bf)
    jax.block_until_ready(out_bf)
    assert out_bf.shape == (batch, output_dim)
    assert jnp.allclose(out_bf, ref, atol=3e-2, rtol=3e-2)

    # Larger batch: exercises multiple batch tiles (both TCs on v7x) and the
    # streamed fallback path.
    batch2 = 40
    x2 = jax.random.normal(k_in2, (batch2, input_dim), jnp.float32)
    ref2 = reference(x2)

    out2 = basic_mlp_forward(x2, w32, b32, out_dim=output_dim, layer_pads=pads)
    jax.block_until_ready(out2)
    assert jnp.allclose(out2, ref2, atol=1e-5, rtol=1e-5)

    out2_s = basic_mlp_forward(x2, w32, b32, out_dim=output_dim,
                               layer_pads=pads, force_streamed=True)
    jax.block_until_ready(out2_s)
    assert jnp.allclose(out2_s, ref2, atol=1e-5, rtol=1e-5)

    print("KERNEL_OK")
</pallas_src>

<mosaic_0001>
module attributes {stable_mosaic.version = 11 : i64} {
  func.func @_mlp_kernel_resident(%arg0: i32, %arg1: memref<8x128xf32, #tpu.memory_space<vmem>>, %arg2: memref<2x128x128xf32, #tpu.memory_space<vmem>>, %arg3: memref<2x1x128xf32, #tpu.memory_space<vmem>>, %arg4: memref<8x128xf32, #tpu.memory_space<vmem>>) attributes {dimension_semantics = [#tpu.dimension_semantics<parallel>], iteration_bounds = array<i64: 1>, scalar_prefetch = 0 : i64, scratch_operands = 0 : i64, tpu.core_type = #tpu.core_type<tc>, window_params = [{transform_indices = @transform_0, window_bounds = array<i64: 8, 128>}, {pipeline_mode = #tpu.pipeline_mode<synchronous>, transform_indices = @transform_1, window_bounds = array<i64: 2, 128, 128>}, {pipeline_mode = #tpu.pipeline_mode<synchronous>, transform_indices = @transform_2, window_bounds = array<i64: 2, 1, 128>}, {transform_indices = @transform_3, window_bounds = array<i64: 8, 128>}]} {
    %c0 = arith.constant 0 : index
    %c0_0 = arith.constant 0 : index
    %0 = vector.load %arg1[%c0, %c0_0] : memref<8x128xf32, #tpu.memory_space<vmem>>, vector<8x128xf32>
    %c0_1 = arith.constant 0 : index
    %c0_2 = arith.constant 0 : index
    %c0_3 = arith.constant 0 : index
    %1 = vector.load %arg2[%c0_1, %c0_2, %c0_3] : memref<2x128x128xf32, #tpu.memory_space<vmem>>, vector<1x128x128xf32>
    %2 = vector.shape_cast %1 : vector<1x128x128xf32> to vector<128x128xf32>
    %c0_4 = arith.constant 0 : index
    %c0_5 = arith.constant 0 : index
    %c0_6 = arith.constant 0 : index
    %3 = vector.load %arg3[%c0_4, %c0_5, %c0_6] : memref<2x1x128xf32, #tpu.memory_space<vmem>>, vector<1x1x128xf32>
    %4 = vector.shape_cast %3 : vector<1x1x128xf32> to vector<1x128xf32>
    %cst = arith.constant dense<0.000000e+00> : vector<8x128xf32>
    %5 = tpu.matmul %0, %2, %cst {dimension_numbers = #tpu.dot_dimension_numbers<[1], [0], [0], [1], [0, 0, 1, 1], [], []>} : vector<8x128xf32>, vector<128x128xf32>, vector<8x128xf32> -> vector<8x128xf32>
    %6 = vector.broadcast %4 : vector<1x128xf32> to vector<8x128xf32>
    %7 = arith.addf %5, %6 : vector<8x128xf32>
    %cst_7 = arith.constant 0.000000e+00 : f32
    %8 = vector.broadcast %cst_7 : f32 to vector<8x128xf32>
    %9 = arith.maximumf %7, %8 : vector<8x128xf32>
    %c1 = arith.constant 1 : index
    %c0_8 = arith.constant 0 : index
    %c0_9 = arith.constant 0 : index
    %10 = vector.load %arg2[%c1, %c0_8, %c0_9] : memref<2x128x128xf32, #tpu.memory_space<vmem>>, vector<1x128x128xf32>
    %11 = vector.shape_cast %10 : vector<1x128x128xf32> to vector<128x128xf32>
    %c1_10 = arith.constant 1 : index
    %c0_11 = arith.constant 0 : index
    %c0_12 = arith.constant 0 : index
    %12 = vector.load %arg3[%c1_10, %c0_11, %c0_12] : memref<2x1x128xf32, #tpu.memory_space<vmem>>, vector<1x1x128xf32>
    %13 = vector.shape_cast %12 : vector<1x1x128xf32> to vector<1x128xf32>
    %cst_13 = arith.constant dense<0.000000e+00> : vector<8x128xf32>
    %14 = tpu.matmul %9, %11, %cst_13 {dimension_numbers = #tpu.dot_dimension_numbers<[1], [0], [0], [1], [0, 0, 1, 1], [], []>} : vector<8x128xf32>, vector<128x128xf32>, vector<8x128xf32> -> vector<8x128xf32>
    %15 = vector.broadcast %13 : vector<1x128xf32> to vector<8x128xf32>
    %16 = arith.addf %14, %15 : vector<8x128xf32>
    %cst_14 = arith.constant 0.000000e+00 : f32
    %17 = vector.broadcast %cst_14 : f32 to vector<8x128xf32>
    %18 = arith.maximumf %16, %17 : vector<8x128xf32>
    %c0_15 = arith.constant 0 : index
    %c0_16 = arith.constant 0 : index
    %19 = vector.load %arg4[%c0_15, %c0_16] : memref<8x128xf32, #tpu.memory_space<vmem>>, vector<8x128xf32>
    tpu.vector_store %arg4[%c0_15, %c0_16], %18 {strides = array<i32>} : memref<8x128xf32, #tpu.memory_space<vmem>>, vector<8x128xf32>,
    return
  }
  func.func @transform_0(%arg0: i32) -> (i32, i32) {
    %c0_i32 = arith.constant 0 : i32
    %c0_i32_0 = arith.constant 0 : i32
    return %arg0, %c0_i32 : i32, i32
  }
  func.func @transform_1(%arg0: i32) -> (i32, i32, i32) {
    %c0_i32 = arith.constant 0 : i32
    %c0_i32_0 = arith.constant 0 : i32
    %c0_i32_1 = arith.constant 0 : i32
    %c0_i32_2 = arith.constant 0 : i32
    return %c0_i32, %c0_i32_0, %c0_i32_1 : i32, i32, i32
  }
  func.func @transform_2(%arg0: i32) -> (i32, i32, i32) {
    %c0_i32 = arith.constant 0 : i32
    %c0_i32_0 = arith.constant 0 : i32
    %c0_i32_1 = arith.constant 0 : i32
    %c0_i32_2 = arith.constant 0 : i32
    return %c0_i32, %c0_i32_0, %c0_i32_1 : i32, i32, i32
  }
  func.func @transform_3(%arg0: i32) -> (i32, i32) {
    %c0_i32 = arith.constant 0 : i32
    %c0_i32_0 = arith.constant 0 : i32
    return %arg0, %c0_i32 : i32, i32
  }
}

</mosaic_0001>

<bundles_post_ra>
// kernel: basic_mlp_forward.1
= control target key start
LH: loop header
LB: loop body
LE: loop exit
PB: predicated region body
PF: predicated region fallthrough
CT: control target
= control target key end

     0   :  { %8 = vsyncpa [#allocation3], 0  ;;  %s359_s12 = smov [#allocation2]   ;;  %s433_s0 = inlined_call_operand.vmem [shape: f32[8,128], index: 0, kind: input, shape index: {}]   ;;  %s434_s1 = inlined_call_operand.hbm [shape: f32[2,128,128], index: 1, kind: input, shape index: {}]   ;;  %s435_s2 = inlined_call_operand.vmem [shape: f32[2,1,128], index: 2, kind: input, shape index: {}]   ;;  %s436_s3 = inlined_call_operand.vmem [shape: f32[8,128], index: 3, kind: output, shape index: {}]  }
   0x1   :  { %s16_s13 = sshll.u32 %s359_s12, 4  ;;  %s17_s13 = int_to_ptr.vmem [resolvable:$true] %s16_s13 }
   0x2   :  { %s345_s14 = scalar_lea.vmem %s17_s13, 4096  ;;  %p350_p1 = scmp.lt.s32.totalorder %s17_s13, %s17_s13 }
   0x3   :  { %p346_p0 = scmp.ne.s32.totalorder %s17_s13, %s345_s14  ;;  %p351_p2 = scmp.lt.s32.totalorder %s345_s14, %s345_s14 }
   0x5   :  { %p352_p3 = por %p351_p2, %p350_p1 }
   0x7   :  { %p353_p4 = pnand %p352_p3, %p346_p0 }
   0x9   :  { %356 = shalt.err (!%p353_p4)
}
   0xa   :  { %s360_s15 = smov 128   ;;  %s361_s16 = smov 8  }
   0xb   :  { %22 = dma.hbm_to_vmem [thread:$0]  %s434_s1, 4096, %s17_s13, [#allocation3], %s360_s15, %s360_s15, %s361_s16  }
   0xc   :  { %357 = dma.done.wait [#allocation3], 4096  }
   0xd   :  { %358 = vsyncadd [#allocation3], 4294963200  ;;  %v362_v0 = vmov 0.0   ;;  %vm363_vm0 = vmmov 0   ;;  %v44_v1 = vld [vmem:[#allocation2 + $0x78] sm:$0xff]  ;;  %v43_v2 = vld [vmem:[#allocation2 + $0x70] sm:$0xff] }
   0xe   :  { %262 = vmatprep.subr.mxu0 %v362_v0  ;;  %294 = vmatprep.mubr.msk.f32.mxu0 %vm363_vm0, %v362_v0  ;;  %v42_v3 = vld [vmem:[#allocation2 + $0x68] sm:$0xff]  ;;  %v41_v4 = vld [vmem:[#allocation2 + $0x60] sm:$0xff]  ;;  %v139_v5 = vld [vmem:[#allocation2 + $0xf8] sm:$0xff] }
   0xf   :  { %297 = vmatprep.subr.mxu1 %v362_v0  ;;  %329 = vmatprep.mubr.msk.f32.mxu1 %vm363_vm0, %v362_v0  ;;  %v40_v6 = vld [vmem:[#allocation2 + $0x58] sm:$0xff]  ;;  %v138_v7 = vld [vmem:[#allocation2 + $0xf0] sm:$0xff]  ;;  %v137_v8 = vld [vmem:[#allocation2 + $0xe8] sm:$0xff] }
  0x10   :  { %263 = vmatpush3.msra.mxu0 %v44_v1  ;;  %298 = vmatpush3.msra.mxu1 %v139_v5  ;;  %v39_v9 = vld [vmem:[#allocation2 + $0x50] sm:$0xff]  ;;  %v136_v10 = vld [vmem:[#allocation2 + $0xe0] sm:$0xff]  ;;  %v38_v11 = vld [vmem:[#allocation2 + $0x48] sm:$0xff] }
  0x11   :  { %264 = vmatprep.subr.mxu0 %v362_v0  ;;  %299 = vmatprep.subr.mxu1 %v362_v0  ;;  %v135_v12 = vld [vmem:[#allocation2 + $0xd8] sm:$0xff]  ;;  %v37_v13 = vld [vmem:[#allocation2 + $0x40] sm:$0xff]  ;;  %v134_v14 = vld [vmem:[#allocation2 + $0xd0] sm:$0xff] }
  0x12   :  { %265 = vmatpush3.msra.mxu0 %v43_v2  ;;  %300 = vmatpush3.msra.mxu1 %v138_v7  ;;  %v36_v15 = vld [vmem:[#allocation2 + $0x38] sm:$0xff]  ;;  %v133_v16 = vld [vmem:[#allocation2 + $0xc8] sm:$0xff]  ;;  %v35_v17 = vld [vmem:[#allocation2 + $0x30] sm:$0xff] }
  0x13   :  { %266 = vmatprep.subr.mxu0 %v362_v0  ;;  %301 = vmatprep.subr.mxu1 %v362_v0  ;;  %v132_v18 = vld [vmem:[#allocation2 + $0xc0] sm:$0xff]  ;;  %v34_v19 = vld [vmem:[#allocation2 + $0x28] sm:$0xff]  ;;  %v131_v20 = vld [vmem:[#allocation2 + $0xb8] sm:$0xff] }
  0x14   :  { %267 = vmatpush3.msra.mxu0 %v42_v3  ;;  %302 = vmatpush3.msra.mxu1 %v137_v8  ;;  %v33_v21 = vld [vmem:[#allocation2 + $0x20] sm:$0xff]  ;;  %v130_v22 = vld [vmem:[#allocation2 + $0xb0] sm:$0xff]  ;;  %v32_v23 = vld [vmem:[#allocation2 + $0x18] sm:$0xff] }
  0x15   :  { %268 = vmatprep.subr.mxu0 %v362_v0  ;;  %303 = vmatprep.subr.mxu1 %v362_v0  ;;  %v129_v24 = vld [vmem:[#allocation2 + $0xa8] sm:$0xff]  ;;  %v31_v25 = vld [vmem:[#allocation2 + $0x10] sm:$0xff]  ;;  %v128_v26 = vld [vmem:[#allocation2 + $0xa0] sm:$0xff] }
  0x16   :  { %269 = vmatpush3.msra.mxu0 %v41_v4  ;;  %304 = vmatpush3.msra.mxu1 %v136_v10  ;;  %v30_v27 = vld [vmem:[#allocation2 + $0x8] sm:$0xff]  ;;  %v127_v28 = vld [vmem:[#allocation2 + $0x98] sm:$0xff]  ;;  %v29_v29 = vld [vmem:[#allocation2] sm:$0xff] }
  0x17   :  { %270 = vmatprep.subr.mxu0 %v362_v0  ;;  %305 = vmatprep.subr.mxu1 %v362_v0  ;;  %v28_v30 = vld [vmem:[%s433_s0] sm:$0xff]  ;;  %v126_v31 = vld [vmem:[#allocation2 + $0x90] sm:$0xff]  ;;  %v125_v32 = vld [vmem:[#allocation2 + $0x88] sm:$0xff] }
  0x18   :  { %271 = vmatpush3.msra.mxu0 %v40_v6  ;;  %306 = vmatpush3.msra.mxu1 %v135_v12  ;;  %v124_v33 = vld [vmem:[#allocation2 + $0x80] sm:$0xff] }
  0x19   :  { %272 = vmatprep.subr.mxu0 %v362_v0  ;;  %307 = vmatprep.subr.mxu1 %v362_v0  ;;  %v225_v34 = vld [vmem:[%s435_s2] ss:$0 sm:$0xff]  ;;  %v227_v39 = vld [vmem:[%s435_s2 + $0x1] ss:$0 sm:$0xff] }
  0x1a   :  { %273 = vmatpush3.msra.mxu0 %v39_v9  ;;  %308 = vmatpush3.msra.mxu1 %v134_v14 }
  0x1b   :  { %274 = vmatprep.subr.mxu0 %v362_v0  ;;  %309 = vmatprep.subr.mxu1 %v362_v0 }
  0x1c   :  { %275 = vmatpush3.msra.mxu0 %v38_v11  ;;  %310 = vmatpush3.msra.mxu1 %v133_v16 }
  0x1d   :  { %276 = vmatprep.subr.mxu0 %v362_v0  ;;  %311 = vmatprep.subr.mxu1 %v362_v0 }
  0x1e   :  { %277 = vmatpush3.msra.mxu0 %v37_v13  ;;  %312 = vmatpush3.msra.mxu1 %v132_v18 }
  0x1f   :  { %278 = vmatprep.subr.mxu0 %v362_v0  ;;  %313 = vmatprep.subr.mxu1 %v362_v0 }
  0x20   :  { %279 = vmatpush3.msra.mxu0 %v36_v15  ;;  %314 = vmatpush3.msra.mxu1 %v131_v20 }
  0x21   :  { %280 = vmatprep.subr.mxu0 %v362_v0  ;;  %315 = vmatprep.subr.mxu1 %v362_v0 }
  0x22   :  { %281 = vmatpush3.msra.mxu0 %v35_v17  ;;  %316 = vmatpush3.msra.mxu1 %v130_v22 }
  0x23   :  { %282 = vmatprep.subr.mxu0 %v362_v0  ;;  %317 = vmatprep.subr.mxu1 %v362_v0 }
  0x24   :  { %283 = vmatpush3.msra.mxu0 %v34_v19  ;;  %318 = vmatpush3.msra.mxu1 %v129_v24 }
  0x25   :  { %284 = vmatprep.subr.mxu0 %v362_v0  ;;  %319 = vmatprep.subr.mxu1 %v362_v0 }
  0x26   :  { %285 = vmatpush3.msra.mxu0 %v33_v21  ;;  %320 = vmatpush3.msra.mxu1 %v128_v26 }
  0x27   :  { %286 = vmatprep.subr.mxu0 %v362_v0  ;;  %321 = vmatprep.subr.mxu1 %v362_v0 }
  0x28   :  { %287 = vmatpush3.msra.mxu0 %v32_v23  ;;  %322 = vmatpush3.msra.mxu1 %v127_v28 }
  0x29   :  { %288 = vmatprep.subr.mxu0 %v362_v0  ;;  %323 = vmatprep.subr.mxu1 %v362_v0 }
  0x2a   :  { %289 = vmatpush3.msra.mxu0 %v31_v25  ;;  %324 = vmatpush3.msra.mxu1 %v126_v31 }
  0x2b   :  { %290 = vmatprep.subr.mxu0 %v362_v0  ;;  %325 = vmatprep.subr.mxu1 %v362_v0 }
  0x2c   :  { %291 = vmatpush3.msra.mxu0 %v30_v27  ;;  %326 = vmatpush3.msra.mxu1 %v125_v32 }
  0x2d   :  { %292 = vmatprep.subr.mxu0 %v362_v0  ;;  %327 = vmatprep.subr.mxu1 %v362_v0 }
  0x2e   :  { %293 = vmatpush3.msra.mxu0 %v29_v29  ;;  %328 = vmatpush3.msra.mxu1 %v124_v33 }
  0x2f   :  { %295 = vmatmul.mubr.f32.vlgmr.msra.gmra.mxu0 %v28_v30 }
  0xef   :  { %v118_v35 = vpop.f32.mrf.mxu0 }
  0xf0   :  { %v119_v36 = vadd.f32 %v225_v34, %v118_v35 }
  0xf1   :  { %v296_v37 = vpop.f32.mrf.mxu0 }
  0xf2   :  { %v122_v38 = vmax.f32 %v119_v36, 0.0 }
  0xf4   :  { %330 = vmatmul.mubr.f32.vlgmr.msra.gmra.mxu1 %v122_v38 }
 0x1b4   :  { %v214_v40 = vpop.f32.mrf.mxu1 }
 0x1b5   :  { %v215_v41 = vadd.f32 %v227_v39, %v214_v40 }
 0x1b6   :  { %v331_v42 = vpop.f32.mrf.mxu1 }
 0x1b7   :  { %v218_v43 = vmax.f32 %v215_v41, 0.0 }
 0x1b9   :  { %219 = vst [vmem:[%s436_s3] sm:$0xff] %v218_v43 }
 0x1ba   :  { %224 = vsyncpa [#allocation3], 1 }

</bundles_post_ra>
